<compile_context>
chip_gen: v6e
topology: v6e:2x2x1
jax: 0.10.0
libtpu: 0.0.40
codegen_flags: <defaults>
</compile_context>

<pallas_src>
import functools

import jax
import jax.numpy as jnp
import numpy as np
from jax import lax
from jax.experimental import pallas as pl
from jax.experimental.pallas import tpu as pltpu

_NEG_INF = float(np.finfo(np.float32).max) * -0.7   # finite "-inf" (avoids exp NaN)


def _qkv_proj_kernel(x_ref, wqkv_ref, q_ref, k_ref, v_ref, *, n_embd):
    """One (batch, row-tile) grid point: qkv = x_tile @ Wqkv (Q columns pre-scaled)."""
    C = n_embd
    qkv = jnp.dot(x_ref[0], wqkv_ref[...], preferred_element_type=jnp.float32)
    q_ref[0] = qkv[:, :C].astype(q_ref.dtype)
    k_ref[0] = qkv[:, C:2 * C].astype(k_ref.dtype)
    v_ref[0] = qkv[:, 2 * C:].astype(v_ref.dtype)


def _flash_attn_kernel(q_ref, k_ref, v_ref, wp_ref, bp_ref, o_ref,
                       m_sc, l_sc, acc_sc, *, num_heads, head_size, tile):
    """One (batch, q-tile, k-tile) grid point of causal flash attention + out-proj."""
    H, D = num_heads, head_size
    C = H * D
    f32 = jnp.float32
    qi = pl.program_id(1)
    ki = pl.program_id(2)
    nk = pl.num_programs(2)

    @pl.when(ki == 0)
    def _init():
        m_sc[...] = jnp.full_like(m_sc, _NEG_INF)
        l_sc[...] = jnp.zeros_like(l_sc)
        acc_sc[...] = jnp.zeros_like(acc_sc)

    def process(masked):
        q = q_ref[0]                     # (tile, C) bf16
        k = k_ref[0]                     # (tile, C) bf16
        v = v_ref[0]                     # (tile, C) bf16
        if masked:                       # tril mask, only for the diagonal key tile
            row = lax.broadcasted_iota(jnp.int32, (tile, tile), 0)
            col = lax.broadcasted_iota(jnp.int32, (tile, tile), 1)
            vis = col <= row
        for h in range(H):
            lo, hi = h * D, (h + 1) * D
            q_h, k_h, v_h = q[:, lo:hi], k[:, lo:hi], v[:, lo:hi]
            # bf16 MXU operands, f32 accumulation
            s = lax.dot_general(q_h, k_h, (((1,), (1,)), ((), ())),
                                preferred_element_type=f32)       # (tile, tile) f32
            if masked:
                s = jnp.where(vis, s, _NEG_INF)
            m_p = m_sc[:, h:h + 1]                                # (tile, 1)
            l_p = l_sc[:, h:h + 1]                                # (tile, 1)
            a_p = acc_sc[:, lo:hi]                                # (tile, D)
            m_n = jnp.maximum(m_p, jnp.max(s, axis=-1, keepdims=True))
            alpha = jnp.exp(m_p - m_n)
            p = jnp.exp(s - m_n)
            l_n = alpha * l_p + jnp.sum(p, axis=-1, keepdims=True)
            a_n = alpha * a_p + jnp.dot(p.astype(v_h.dtype), v_h,
                                        preferred_element_type=f32)
            m_sc[:, h:h + 1] = m_n
            l_sc[:, h:h + 1] = l_n
            acc_sc[:, lo:hi] = a_n

    @pl.when(ki < qi)          # fully-visible off-diagonal key tiles: no mask ops
    def _off_diag():
        process(masked=False)

    @pl.when(ki == qi)         # diagonal key tile: apply the tril mask
    def _diag():
        process(masked=True)

    # Key tiles with ki > qi are fully masked: no compute here, and their K/V
    # index_map is clamped to the diagonal block, so no DMA is issued either.

    @pl.when(ki == nk - 1)
    def _finalize():
        # Normalize in place (accumulator stays lane-dense; no concat relayout).
        for h in range(H):
            lo, hi = h * D, (h + 1) * D
            inv = pl.reciprocal(l_sc[:, h:h + 1], approx=True)
            acc_sc[:, lo:hi] = acc_sc[:, lo:hi] * inv
        attn = acc_sc[...].astype(wp_ref.dtype)                   # (tile, C) bf16
        y = jnp.dot(attn, wp_ref[...], preferred_element_type=f32)
        y = y + bp_ref[...]
        o_ref[0] = y.astype(o_ref.dtype)


def multi_head_attention(x, wq, wk, wv, wproj, bproj, *, tile=None,
                         compute_dtype=jnp.bfloat16):
    """x: (B, T, C); wq/wk/wv: (H, C, D); wproj: (H, D, C); bproj: (C,)."""
    B, T, C = x.shape
    H, _, D = wq.shape
    assert H * D == C

    # Lane-dense fused QKV weight, pre-cast to bf16 in the wrapper.
    # The PyTorch scale C**-0.5 (n_embd, per the module, not head_size) folds into Wq.
    scale = float(C) ** -0.5
    to2d = lambda w: jnp.transpose(w, (1, 0, 2)).reshape(C, H * D)
    wqkv = jnp.concatenate([to2d(wq) * scale, to2d(wk), to2d(wv)],
                           axis=1).astype(compute_dtype)           # (C, 3C) bf16
    wp2 = wproj.reshape(C, C).astype(compute_dtype)                # (C, C)  bf16
    bp2 = bproj.reshape(1, C).astype(jnp.float32)                  # (1, C)  f32
    x_c = x.astype(compute_dtype)

    # Tile heuristic: one tile for short sequences (T=48 test -> single grid point
    # per batch element); 256-wide tiles preferred for long T (fills v6e/v7x MXU).
    if tile is None:
        if T <= 256:
            tile = T
        else:
            tile = T
            for cand in (256, 128, 64, 32, 16, 8):
                if T % cand == 0:
                    tile = cand
                    break
    assert T % tile == 0 and (tile == T or tile % 8 == 0)
    nt = T // tile

    # ---- pass 1: Q/K/V projection, computed exactly once (bf16 outputs) ----------
    q, k, v = pl.pallas_call(
        functools.partial(_qkv_proj_kernel, n_embd=C),
        out_shape=tuple(jax.ShapeDtypeStruct((B, T, C), compute_dtype)
                        for _ in range(3)),
        grid_spec=pltpu.PrefetchScalarGridSpec(
            num_scalar_prefetch=0,
            grid=(B, nt),
            in_specs=[
                pl.BlockSpec((1, tile, C), lambda b, i: (b, i, 0)),
                pl.BlockSpec((C, 3 * C), lambda b, i: (0, 0)),
            ],
            out_specs=tuple(pl.BlockSpec((1, tile, C), lambda b, i: (b, i, 0))
                            for _ in range(3)),
        ),
        compiler_params=pltpu.CompilerParams(
            dimension_semantics=("parallel", "parallel")),
    )(x_c, wqkv)

    # ---- pass 2: causal flash attention + fused output projection ----------------
    kernel = functools.partial(_flash_attn_kernel, num_heads=H, head_size=D,
                               tile=tile)
    return pl.pallas_call(
        kernel,
        out_shape=jax.ShapeDtypeStruct((B, T, C), x.dtype),
        grid_spec=pltpu.PrefetchScalarGridSpec(
            num_scalar_prefetch=0,
            grid=(B, nt, nt),
            in_specs=[
                pl.BlockSpec((1, tile, C), lambda b, i, j: (b, i, 0)),          # Q
                # causal: key tiles above the diagonal map to the diagonal block
                # (block index unchanged -> Pallas issues no DMA for skipped tiles)
                pl.BlockSpec((1, tile, C),
                             lambda b, i, j: (b, jnp.minimum(j, i), 0)),        # K
                pl.BlockSpec((1, tile, C),
                             lambda b, i, j: (b, jnp.minimum(j, i), 0)),        # V
                pl.BlockSpec((C, C), lambda b, i, j: (0, 0)),                   # Wproj
                pl.BlockSpec((1, C), lambda b, i, j: (0, 0)),                   # bproj
            ],
            out_specs=pl.BlockSpec((1, tile, C), lambda b, i, j: (b, i, 0)),
            scratch_shapes=[
                pltpu.VMEM((tile, H), jnp.float32),   # running max  (lane-packed)
                pltpu.VMEM((tile, H), jnp.float32),   # running sum  (lane-packed)
                pltpu.VMEM((tile, C), jnp.float32),   # accumulator  (lane-dense)
            ]),
        compiler_params=pltpu.CompilerParams(
            # B leads so megacore sharding stays balanced despite the causal axis
            dimension_semantics=("parallel", "parallel", "arbitrary")),
    )(q, k, v, wp2, bp2)


def _reference(x, wq, wk, wv, wproj, bproj):
    B, T, C = x.shape
    q = jnp.einsum('btc,hcd->bhtd', x, wq)
    k = jnp.einsum('btc,hcd->bhtd', x, wk)
    v = jnp.einsum('btc,hcd->bhtd', x, wv)
    wei = jnp.einsum('bhtd,bhsd->bhts', q, k) * (C ** -0.5)
    mask = jnp.tril(jnp.ones((T, T), bool))
    wei = jnp.where(mask[None, None], wei, -jnp.inf)
    wei = jax.nn.softmax(wei, axis=-1)
    out = jnp.einsum('bhts,bhsd->bhtd', wei, v)
    y = jnp.einsum('bhtd,hdc->btc', out, wproj) + bproj[None, None, :]
    return y


if __name__ == "__main__":
    # shapes consistent with the module's forward (T == block_size == 48)
    B, T = 2, 48
    n_embd = 32
    num_heads = 4
    head_size = n_embd // num_heads

    key = jax.random.PRNGKey(0)
    kx, kq, kk, kv, kp, kb = jax.random.split(key, 6)

    x = jax.random.normal(kx, (B, T, n_embd), dtype=jnp.float32)

    # deterministic synthetic parameters (shapes from the nn.Linear specs):
    #  Head.key/query/value: Linear(n_embd, head_size, bias=False) per head -> (H, C, D)
    #  proj: Linear(n_embd, n_embd) -> weight.T stored as (H, D, C)
    s = 0.1
    wq = s * jax.random.normal(kq, (num_heads, n_embd, head_size), jnp.float32)
    wk = s * jax.random.normal(kk, (num_heads, n_embd, head_size), jnp.float32)
    wv = s * jax.random.normal(kv, (num_heads, n_embd, head_size), jnp.float32)
    wproj = s * jax.random.normal(kp, (num_heads, head_size, n_embd), jnp.float32)
    bproj = s * jax.random.normal(kb, (n_embd,), jnp.float32)

    out = multi_head_attention(x, wq, wk, wv, wproj, bproj)
    out = jax.block_until_ready(out)

    ref = _reference(x, wq, wk, wv, wproj, bproj)
    # bf16 MXU operands / bf16 Q,K,V intermediates + approx reciprocal -> relaxed tol
    np.testing.assert_allclose(np.asarray(out), np.asarray(ref), rtol=2e-2, atol=2e-2)

    print("KERNEL_OK")
</pallas_src>

<mosaic_0001>
module attributes {stable_mosaic.version = 11 : i64} {
  func.func @_qkv_proj_kernel(%arg0: i32, %arg1: i32, %arg2: memref<1x48x32xbf16, #tpu.memory_space<vmem>>, %arg3: memref<32x96xbf16, #tpu.memory_space<vmem>>, %arg4: memref<1x48x32xbf16, #tpu.memory_space<vmem>>, %arg5: memref<1x48x32xbf16, #tpu.memory_space<vmem>>, %arg6: memref<1x48x32xbf16, #tpu.memory_space<vmem>>) attributes {dimension_semantics = [#tpu.dimension_semantics<parallel>, #tpu.dimension_semantics<parallel>], iteration_bounds = array<i64: 2, 1>, scalar_prefetch = 0 : i64, scratch_operands = 0 : i64, tpu.core_type = #tpu.core_type<tc>, window_params = [{transform_indices = @transform_0, window_bounds = array<i64: 1, 48, 32>}, {pipeline_mode = #tpu.pipeline_mode<synchronous>, transform_indices = @transform_1, window_bounds = array<i64: 32, 96>}, {transform_indices = @transform_2, window_bounds = array<i64: 1, 48, 32>}, {transform_indices = @transform_3, window_bounds = array<i64: 1, 48, 32>}, {transform_indices = @transform_4, window_bounds = array<i64: 1, 48, 32>}]} {
    %c0 = arith.constant 0 : index
    %c0_0 = arith.constant 0 : index
    %c0_1 = arith.constant 0 : index
    %0 = vector.load %arg2[%c0, %c0_0, %c0_1] : memref<1x48x32xbf16, #tpu.memory_space<vmem>>, vector<1x48x32xbf16>
    %1 = vector.shape_cast %0 : vector<1x48x32xbf16> to vector<48x32xbf16>
    %c0_2 = arith.constant 0 : index
    %c0_3 = arith.constant 0 : index
    %2 = vector.load %arg3[%c0_2, %c0_3] : memref<32x96xbf16, #tpu.memory_space<vmem>>, vector<32x96xbf16>
    %cst = arith.constant dense<0.000000e+00> : vector<48x96xf32>
    %3 = tpu.matmul %1, %2, %cst {dimension_numbers = #tpu.dot_dimension_numbers<[1], [0], [0], [1], [0, 0, 1, 1], [], []>} : vector<48x32xbf16>, vector<32x96xbf16>, vector<48x96xf32> -> vector<48x96xf32>
    %4 = vector.extract_strided_slice %3 {offsets = [0, 0], sizes = [48, 32], strides = [1, 1]} : vector<48x96xf32> to vector<48x32xf32>
    %5 = arith.truncf %4 : vector<48x32xf32> to vector<48x32xbf16>
    %c0_4 = arith.constant 0 : index
    %c0_5 = arith.constant 0 : index
    %c0_6 = arith.constant 0 : index
    %6 = vector.load %arg4[%c0_4, %c0_5, %c0_6] : memref<1x48x32xbf16, #tpu.memory_space<vmem>>, vector<1x48x32xbf16>
    %7 = vector.shape_cast %6 : vector<1x48x32xbf16> to vector<48x32xbf16>
    %8 = vector.shape_cast %5 : vector<48x32xbf16> to vector<1x48x32xbf16>
    tpu.vector_store %arg4[%c0_4, %c0_5, %c0_6], %8 {strides = array<i32>} : memref<1x48x32xbf16, #tpu.memory_space<vmem>>, vector<1x48x32xbf16>,
    %9 = vector.extract_strided_slice %3 {offsets = [0, 32], sizes = [48, 32], strides = [1, 1]} : vector<48x96xf32> to vector<48x32xf32>
    %10 = arith.truncf %9 : vector<48x32xf32> to vector<48x32xbf16>
    %c0_7 = arith.constant 0 : index
    %c0_8 = arith.constant 0 : index
    %c0_9 = arith.constant 0 : index
    %11 = vector.load %arg5[%c0_7, %c0_8, %c0_9] : memref<1x48x32xbf16, #tpu.memory_space<vmem>>, vector<1x48x32xbf16>
    %12 = vector.shape_cast %11 : vector<1x48x32xbf16> to vector<48x32xbf16>
    %13 = vector.shape_cast %10 : vector<48x32xbf16> to vector<1x48x32xbf16>
    tpu.vector_store %arg5[%c0_7, %c0_8, %c0_9], %13 {strides = array<i32>} : memref<1x48x32xbf16, #tpu.memory_space<vmem>>, vector<1x48x32xbf16>,
    %14 = vector.extract_strided_slice %3 {offsets = [0, 64], sizes = [48, 32], strides = [1, 1]} : vector<48x96xf32> to vector<48x32xf32>
    %15 = arith.truncf %14 : vector<48x32xf32> to vector<48x32xbf16>
    %c0_10 = arith.constant 0 : index
    %c0_11 = arith.constant 0 : index
    %c0_12 = arith.constant 0 : index
    %16 = vector.load %arg6[%c0_10, %c0_11, %c0_12] : memref<1x48x32xbf16, #tpu.memory_space<vmem>>, vector<1x48x32xbf16>
    %17 = vector.shape_cast %16 : vector<1x48x32xbf16> to vector<48x32xbf16>
    %18 = vector.shape_cast %15 : vector<48x32xbf16> to vector<1x48x32xbf16>
    tpu.vector_store %arg6[%c0_10, %c0_11, %c0_12], %18 {strides = array<i32>} : memref<1x48x32xbf16, #tpu.memory_space<vmem>>, vector<1x48x32xbf16>,
    return
  }
  func.func @transform_0(%arg0: i32, %arg1: i32) -> (i32, i32, i32) {
    %c0_i32 = arith.constant 0 : i32
    %c0_i32_0 = arith.constant 0 : i32
    return %arg0, %arg1, %c0_i32 : i32, i32, i32
  }
  func.func @transform_1(%arg0: i32, %arg1: i32) -> (i32, i32) {
    %c0_i32 = arith.constant 0 : i32
    %c0_i32_0 = arith.constant 0 : i32
    %c0_i32_1 = arith.constant 0 : i32
    return %c0_i32, %c0_i32_0 : i32, i32
  }
  func.func @transform_2(%arg0: i32, %arg1: i32) -> (i32, i32, i32) {
    %c0_i32 = arith.constant 0 : i32
    %c0_i32_0 = arith.constant 0 : i32
    return %arg0, %arg1, %c0_i32 : i32, i32, i32
  }
  func.func @transform_3(%arg0: i32, %arg1: i32) -> (i32, i32, i32) {
    %c0_i32 = arith.constant 0 : i32
    %c0_i32_0 = arith.constant 0 : i32
    return %arg0, %arg1, %c0_i32 : i32, i32, i32
  }
  func.func @transform_4(%arg0: i32, %arg1: i32) -> (i32, i32, i32) {
    %c0_i32 = arith.constant 0 : i32
    %c0_i32_0 = arith.constant 0 : i32
    return %arg0, %arg1, %c0_i32 : i32, i32, i32
  }
}

</mosaic_0001>

<bundles_post_ra>
// kernel: tpu_custom_call.1
= control target key start
LH: loop header
LB: loop body
LE: loop exit
PB: predicated region body
PF: predicated region fallthrough
CT: control target
= control target key end

     0   :  { %s798_s15 = smov 0   ;;  %s800_s16 = smov 0   ;;  %s875_s0 = inlined_call_operand.vmem [shape: bf16[2,48,32], index: 0, kind: input, shape index: {}]   ;;  %s876_s1 = inlined_call_operand.vmem [shape: bf16[32,96], index: 1, kind: input, shape index: {}]   ;;  %s877_s2 = inlined_call_operand.vmem [shape: bf16[2,48,32], index: 2, kind: output, shape index: {0}]   ;;  %s878_s3 = inlined_call_operand.vmem [shape: bf16[2,48,32], index: 3, kind: output, shape index: {1}]   ;;  %s879_s4 = inlined_call_operand.vmem [shape: bf16[2,48,32], index: 4, kind: output, shape index: {2}]  }
   0x1   :  { %s802_s17 = smov 0  }
   0x2 LB: > { %s27_s18 = sadd.s32 1, %s763_s16  ;;  %p659_p0 = scmp.ge.s32.totalorder %s767_s17, 1  ;;  %s767_s17 = sphi %s802_s17, %s15_s17   ;;  %s763_s16 = sphi %s800_s16, %s881_s16   ;;  %s759_s15 = sphi %s798_s15, %s880_s15  }
   0x3   : > { %p29_p1 = scmp.ge.s32.totalorder %s27_s18, 2  ;;  %p192_p2 = scmp.lt.s32.totalorder %s767_s17, 3 }
   0x5   : > { %s883_s18 = smov (%p29_p1, %s27_s18), 0  ;;  %p193_p3 = pnand %p659_p0, %p192_p2 }
   0x6   : > { %p245_p4 = scmp.lt.s32.totalorder (!%p193_p3), %s759_s15, 1  ;;  %s771_s30 = smov (!%p193_p3), 96  }
   0x7   : > { %196 = sbr.rel (%p193_p3) target bundleno = 352 (0x160), region = 28  ;;  %s772_s5 = smov (!%p193_p3), 64  }
   0xc   : > { %v740_v0 = vld [vmem:[%s876_s1 + $0x8] sm:$0xff]   ;;  %v769_v1 = vmov 0.0   ;;  %v741_v2 = vld [vmem:[%s876_s1] sm:$0xff]   ;;  %vm770_vm0 = vmmov 0   ;;  %s885_s15 = smov (!%p245_p4, %s759_s15), 1  ;;  %vm322_vm1 = vcmask 261120  }
   0xd   : > { %691 = vmatprep.subr.bf16.mxu0 %v769_v1  ;;  %707 = vmatprep.subr.bf16.mxu1 %v769_v1  ;;  %s822_s23 = smul.u32 24, %s885_s15  ;;  %vm413_vm2 = vcmask 257024  }
   0xe   : > { %692 = vmatpush3.bf16.msra.mxu0 %v740_v0  ;;  %709 = vmatpush3.bf16.msra.mxu1 %v740_v0 }
   0xf   : > { %693 = vmatprep.subr.bf16.mxu0 %v769_v1  ;;  %708 = vmatprep.subr.bf16.mxu1 %v769_v1  ;;  %s252_s26 = scalar_lea.vmem %s875_s0, %s822_s23  ;;  %s832_s29 = scalar_lea.vmem %s877_s2, %s822_s23 }
  0x10   : > { %695 = vmatprep.mubr.msk.bf16.mxu0 %vm770_vm0, %v769_v1  ;;  %699 = vmatprep.mubr.msk.bf16.mxu1 %vm770_vm0, %v769_v1  ;;  %v742_v3 = vld [vmem:[%s252_s26] sm:$0xff]   ;;  %v743_v4 = vld [vmem:[%s252_s26 + $0x8] sm:$0xff]   ;;  %v744_v5 = vld [vmem:[%s252_s26 + $0x10] sm:$0xff]   ;;  %s272_s8 = scalar_lea.vmem %s878_s3, %s822_s23  ;;  %s282_s11 = scalar_lea.vmem %s879_s4, %s822_s23 }
  0x12   : > { %694 = vmatpush3.bf16.msra.mxu0 %v741_v2  ;;  %710 = vmatpush3.bf16.msra.mxu1 %v741_v2 }
  0x15   : > { %696 = vmatmul.mubr.msk.bf16.vlgmr.msra.gmra.mxu0 %vm322_vm1, %v742_v3  ;;  %700 = vmatmul.mubr.msk.bf16.vlgmr.msra.gmra.mxu1 %vm322_vm1, %v743_v4 }
  0x16   : > { %703 = vmatprep.mubr.msk.bf16.mxu1 %vm770_vm0, %v769_v1 }
  0x1d   : > { %704 = vmatmul.mubr.msk.bf16.gmra.mxu1 %vm322_vm1, %v744_v5 }
  0xd5   : > { %v366_v6 = vpop.f32.mrf.mxu0  ;;  %v374_v8 = vpop.f32.mrf.mxu1 }
  0xd6   : > { %v680_v7 = vpack.c.bf16 %v366_v6, %v366_v6  ;;  %v682_v9 = vpack.c.bf16 %v374_v8, %v374_v8 }
  0xd7   : > { %v697_v10 = vpop.f32.mrf.mxu0  ;;  %v701_v11 = vpop.f32.mrf.mxu1 }
  0xd8   : > { %414 = vst.msk [vmem:[%s832_s29] sm:$0xf] %vm413_vm2, %v680_v7  ;;  %420 = vrot.lane.b32.xlu0 %v680_v7, %s771_s30  ;;  %416 = vst.msk [vmem:[%s832_s29 + $0x8] sm:$0xf] %vm413_vm2, %v682_v9  ;;  %424 = vrot.lane.b32.xlu1 %v682_v9, %s771_s30 }
  0xd9   : > { %v369_v12 = vpop.f32.mrf.mxu0  ;;  %v377_v14 = vpop.f32.mrf.mxu1 }
  0xda   : > { %v681_v13 = vpack.c.bf16 %v369_v12, %v369_v12  ;;  %v683_v15 = vpack.c.bf16 %v377_v14, %v377_v14 }
  0xdb   : > { %v698_v16 = vpop.f32.mrf.mxu0  ;;  %v702_v17 = vpop.f32.mrf.mxu1 }
  0xdc   : > { %415 = vst.msk [vmem:[%s832_s29 + $0x4] sm:$0xf] %vm413_vm2, %v681_v13  ;;  %444 = vrot.lane.b32.xlu0 %v680_v7, %s772_s5  ;;  %417 = vst.msk [vmem:[%s832_s29 + $0xc] sm:$0xf] %vm413_vm2, %v683_v15  ;;  %426 = vrot.lane.b32.xlu1 %v683_v15, %s771_s30 }
  0xdd   : > { %v382_v18 = vpop.f32.mrf.mxu1 }
  0xde   : > { %v684_v19 = vpack.c.bf16 %v382_v18, %v382_v18 }
  0xdf   : > { %v705_v20 = vpop.f32.mrf.mxu1 }
  0xe0   : > { %448 = vrot.lane.b32.xlu0 %v682_v9, %s772_s5  ;;  %418 = vst.msk [vmem:[%s832_s29 + $0x10] sm:$0xf] %vm413_vm2, %v684_v19  ;;  %446 = vrot.lane.b32.xlu1 %v681_v13, %s772_s5 }
  0xe1   : > { %v385_v21 = vpop.f32.mrf.mxu1 }
  0xe2   : > { %v685_v22 = vpack.c.bf16 %v385_v21, %v385_v21 }
  0xe3   : > { %v706_v23 = vpop.f32.mrf.mxu1 }
  0xe4   : > { %422 = vrot.lane.b32.xlu0 %v681_v13, %s771_s30  ;;  %419 = vst.msk [vmem:[%s832_s29 + $0x14] sm:$0xf] %vm413_vm2, %v685_v22  ;;  %450 = vrot.lane.b32.xlu1 %v683_v15, %s772_s5 }
  0xe8   : > { %428 = vrot.lane.b32.xlu0 %v684_v19, %s771_s30  ;;  %430 = vrot.lane.b32.xlu1 %v685_v22, %s771_s30 }
  0xec   : > { %452 = vrot.lane.b32.xlu0 %v684_v19, %s772_s5  ;;  %454 = vrot.lane.b32.xlu1 %v685_v22, %s772_s5 }
 0x14a   : > { %v421_v24 = vpop.permute.xlu0 %420  ;;  %v425_v25 = vpop.permute.xlu1 %424 }
 0x14b   : > { %438 = vst.msk [vmem:[%s272_s8] sm:$0xf] %vm413_vm2, %v421_v24  ;;  %440 = vst.msk [vmem:[%s272_s8 + $0x8] sm:$0xf] %vm413_vm2, %v425_v25 }
 0x14e   : > { %v445_v26 = vpop.permute.xlu0 %444  ;;  %v427_v27 = vpop.permute.xlu1 %426 }
 0x14f   : > { %462 = vst.msk [vmem:[%s282_s11] sm:$0xf] %vm413_vm2, %v445_v26  ;;  %441 = vst.msk [vmem:[%s272_s8 + $0xc] sm:$0xf] %vm413_vm2, %v427_v27 }
 0x152   : > { %v449_v28 = vpop.permute.xlu0 %448  ;;  %v447_v29 = vpop.permute.xlu1 %446 }
 0x153   : > { %464 = vst.msk [vmem:[%s282_s11 + $0x8] sm:$0xf] %vm413_vm2, %v449_v28  ;;  %463 = vst.msk [vmem:[%s282_s11 + $0x4] sm:$0xf] %vm413_vm2, %v447_v29 }
 0x156   : > { %v423_v30 = vpop.permute.xlu0 %422  ;;  %v451_v31 = vpop.permute.xlu1 %450 }
 0x157   : > { %439 = vst.msk [vmem:[%s272_s8 + $0x4] sm:$0xf] %vm413_vm2, %v423_v30  ;;  %465 = vst.msk [vmem:[%s282_s11 + $0xc] sm:$0xf] %vm413_vm2, %v451_v31 }
 0x15a   : > { %v429_v32 = vpop.permute.xlu0 %428  ;;  %v431_v33 = vpop.permute.xlu1 %430 }
 0x15b   : > { %442 = vst.msk [vmem:[%s272_s8 + $0x10] sm:$0xf] %vm413_vm2, %v429_v32  ;;  %443 = vst.msk [vmem:[%s272_s8 + $0x14] sm:$0xf] %vm413_vm2, %v431_v33 }
 0x15e   : > { %v453_v34 = vpop.permute.xlu0 %452  ;;  %v455_v35 = vpop.permute.xlu1 %454 }
 0x15f   : > { %466 = vst.msk [vmem:[%s282_s11 + $0x10] sm:$0xf] %vm413_vm2, %v453_v34  ;;  %467 = vst.msk [vmem:[%s282_s11 + $0x14] sm:$0xf] %vm413_vm2, %v455_v35 }
 0x160 PF: > { %s15_s17 = sadd.s32 1, %s767_s17   ;;  %s880_s15 = smov %s763_s16 }
 0x161   : > { %p12_p5 = scmp.ge.s32.totalorder %s15_s17, 4   ;;  %s881_s16 = smov %s883_s18 }
 0x163   :  { %14 = sbr.rel (!%p12_p5) target bundleno = 2 (0x2), region = 82 }

</bundles_post_ra>
